<compile_context>
chip_gen: v6e
topology: v6e:2x2x1
jax: 0.10.0
libtpu: 0.0.40
codegen_flags: <defaults>
</compile_context>

<pallas_src>
import functools

import jax
import jax.numpy as jnp
from jax.experimental import pallas as pl
from jax.experimental.pallas import tpu as pltpu

LN_EPS = 1e-5


def encode_kernel(x_ref, w_ref, p_ref, o_ref):
    # x_ref: (tm, D_in)     row tile of inputs
    # w_ref: (D_in, D_lat)  full linear weight, already in (in x out) layout
    # p_ref: (3, D_lat)     fused [bias; ln_gamma; ln_beta]
    # o_ref: (tm, D_lat)    output tile

    x = x_ref[...]
    w = w_ref[...]
    p = p_ref[...]                      # one load of the fused params tile
    bias = p[0:1, :]
    gamma = p[1:2, :]
    beta = p[2:3, :]

    # Linear: y = x @ W + b   (MXU matmul, f32 accumulate)
    y = jnp.dot(x, w, preferred_element_type=jnp.float32) + bias

    # LayerNorm over the latent (last) dimension, all in f32.
    # One-pass statistics: the two reductions are independent so the XLU can
    # overlap them; clamp guards against tiny negative cancellation.
    mu = jnp.mean(y, axis=-1, keepdims=True)
    m2 = jnp.mean(y * y, axis=-1, keepdims=True)
    var = jnp.maximum(m2 - mu * mu, 0.0)
    inv = jax.lax.rsqrt(var + LN_EPS)
    normed = (y - mu) * inv * gamma + beta

    # ReLU
    o_ref[...] = jnp.maximum(normed, 0.0).astype(o_ref.dtype)


def pack_params(weight, bias, gamma, beta):
    """One-time parameter prep (NOT on the per-call path).

    weight: (D_lat, D_in) PyTorch layout -> transposed to (D_in, D_lat).
    bias/gamma/beta: (D_lat,) -> fused into a single (3, D_lat) array.
    """
    w_t = jnp.asarray(weight).T
    params = jnp.stack(
        [jnp.asarray(bias), jnp.asarray(gamma), jnp.asarray(beta)], axis=0
    )
    return w_t, params


def _sublane_align(dtype):
    # Sub-32-bit dtypes pack along sublanes: 8 rows for 4-byte, 16 for 2-byte,
    # 32 for 1-byte element types.
    return {4: 8, 2: 16, 1: 32}.get(jnp.dtype(dtype).itemsize, 8)


@functools.partial(jax.jit, static_argnames=("tm_max",))
def test_model_forward(x, w_t, params, *, tm_max=4096):
    """x: (B, D_in).  w_t: (D_in, D_lat).  params: (3, D_lat).  -> (B, D_lat)."""
    B, D_in = x.shape
    D_lat = w_t.shape[1]

    # Row tile: cover the whole batch (sublane-aligned) when it fits, so the
    # common small-batch case runs as a single grid step.  Large batches tile
    # at tm_max (per-step DMA ~2 MiB >> per-step overhead; ~5.2 MiB
    # double-buffered fits every chip's default scoped-VMEM budget).
    sub = _sublane_align(x.dtype)
    if B <= tm_max:
        tm = max(sub, ((B + sub - 1) // sub) * sub)
    else:
        tm = tm_max

    num_tiles = pl.cdiv(B, tm)

    # Grid-invariant operands: single-buffer them when there is more than one
    # grid step (double-buffering the resident weight only wastes VMEM).
    if num_tiles > 1:
        const_kwargs = dict(pipeline_mode=pl.Buffered(1))
    else:
        const_kwargs = {}

    itemsize = jnp.dtype(x.dtype).itemsize
    cost = pl.CostEstimate(
        flops=2 * B * D_in * D_lat,
        transcendentals=B,  # one rsqrt per row
        bytes_accessed=(
            B * D_in * itemsize
            + D_in * D_lat * jnp.dtype(w_t.dtype).itemsize
            + 3 * D_lat * jnp.dtype(params.dtype).itemsize
            + B * D_lat * itemsize
        ),
    )

    # No wrapper-side padding / slicing for ragged B: the partial last block is
    # handled by Pallas (rows are independent, OOB writes are discarded).
    out = pl.pallas_call(
        encode_kernel,
        out_shape=jax.ShapeDtypeStruct((B, D_lat), x.dtype),
        grid_spec=pltpu.PrefetchScalarGridSpec(
            num_scalar_prefetch=0,
            grid=(num_tiles,),
            in_specs=[
                pl.BlockSpec((tm, D_in), lambda i: (i, 0)),                      # x rows
                pl.BlockSpec((D_in, D_lat), lambda i: (0, 0), **const_kwargs),   # weight
                pl.BlockSpec((3, D_lat), lambda i: (0, 0), **const_kwargs),      # fused b/g/beta
            ],
            out_specs=pl.BlockSpec((tm, D_lat), lambda i: (i, 0)),
        ),
        compiler_params=pltpu.CompilerParams(
            dimension_semantics=("parallel",)),
        cost_estimate=cost,
    )(x, w_t, params)

    return out


def reference_forward(x, weight, bias, gamma, beta):
    y = x @ weight.T + bias
    mu = jnp.mean(y, axis=-1, keepdims=True)
    var = jnp.mean((y - mu) ** 2, axis=-1, keepdims=True)
    normed = (y - mu) / jnp.sqrt(var + LN_EPS) * gamma + beta
    return jnp.maximum(normed, 0.0)


if __name__ == "__main__":
    # Small shapes consistent with the module: batch=16, input_size=32, latent_dim=128
    B, D_IN, D_LAT = 16, 32, 128

    key = jax.random.PRNGKey(0)
    k_x, k_w, k_b = jax.random.split(key, 3)

    x = jax.random.normal(k_x, (B, D_IN), dtype=jnp.float32)

    # Deterministic parameter init (PyTorch-like uniform bound for Linear).
    bound = 1.0 / (D_IN ** 0.5)
    weight = jax.random.uniform(k_w, (D_LAT, D_IN), jnp.float32, -bound, bound)
    bias = jax.random.uniform(k_b, (D_LAT,), jnp.float32, -bound, bound)
    gamma = jnp.ones((D_LAT,), jnp.float32)   # nn.LayerNorm default weight
    beta = jnp.zeros((D_LAT,), jnp.float32)   # nn.LayerNorm default bias

    # One-time parameter packing (outside the per-call path).
    w_t, params = pack_params(weight, bias, gamma, beta)

    out = test_model_forward(x, w_t, params)
    out = jax.block_until_ready(out)

    ref = reference_forward(x, weight, bias, gamma, beta)
    assert out.shape == (B, D_LAT)
    assert jnp.allclose(out, ref, atol=1e-5, rtol=1e-5), "mismatch vs reference"

    print("KERNEL_OK")
</pallas_src>

<mosaic_0001>
module attributes {stable_mosaic.version = 11 : i64} {
  func.func @encode_kernel(%arg0: i32, %arg1: memref<16x32xf32, #tpu.memory_space<vmem>>, %arg2: memref<32x128xf32, #tpu.memory_space<vmem>>, %arg3: memref<3x128xf32, #tpu.memory_space<vmem>>, %arg4: memref<16x128xf32, #tpu.memory_space<vmem>>) attributes {dimension_semantics = [#tpu.dimension_semantics<parallel>], iteration_bounds = array<i64: 1>, scalar_prefetch = 0 : i64, scratch_operands = 0 : i64, tpu.core_type = #tpu.core_type<tc>, window_params = [{transform_indices = @transform_0, window_bounds = array<i64: 16, 32>}, {pipeline_mode = #tpu.pipeline_mode<synchronous>, transform_indices = @transform_1, window_bounds = array<i64: 32, 128>}, {pipeline_mode = #tpu.pipeline_mode<synchronous>, transform_indices = @transform_2, window_bounds = array<i64: 3, 128>}, {transform_indices = @transform_3, window_bounds = array<i64: 16, 128>}]} {
    %c0 = arith.constant 0 : index
    %c0_0 = arith.constant 0 : index
    %0 = vector.load %arg1[%c0, %c0_0] : memref<16x32xf32, #tpu.memory_space<vmem>>, vector<16x32xf32>
    %c0_1 = arith.constant 0 : index
    %c0_2 = arith.constant 0 : index
    %1 = vector.load %arg2[%c0_1, %c0_2] : memref<32x128xf32, #tpu.memory_space<vmem>>, vector<32x128xf32>
    %c0_3 = arith.constant 0 : index
    %c0_4 = arith.constant 0 : index
    %2 = vector.load %arg3[%c0_3, %c0_4] : memref<3x128xf32, #tpu.memory_space<vmem>>, vector<3x128xf32>
    %3 = vector.extract_strided_slice %2 {offsets = [0, 0], sizes = [1, 128], strides = [1, 1]} : vector<3x128xf32> to vector<1x128xf32>
    %4 = vector.extract_strided_slice %2 {offsets = [1, 0], sizes = [1, 128], strides = [1, 1]} : vector<3x128xf32> to vector<1x128xf32>
    %5 = vector.extract_strided_slice %2 {offsets = [2, 0], sizes = [1, 128], strides = [1, 1]} : vector<3x128xf32> to vector<1x128xf32>
    %cst = arith.constant dense<0.000000e+00> : vector<16x128xf32>
    %6 = tpu.matmul %0, %1, %cst {dimension_numbers = #tpu.dot_dimension_numbers<[1], [0], [0], [1], [0, 0, 1, 1], [], []>} : vector<16x32xf32>, vector<32x128xf32>, vector<16x128xf32> -> vector<16x128xf32>
    %7 = vector.broadcast %3 : vector<1x128xf32> to vector<16x128xf32>
    %8 = arith.addf %6, %7 : vector<16x128xf32>
    %cst_5 = arith.constant dense<0.000000e+00> : vector<16xf32>
    %9 = vector.multi_reduction <add>, %8, %cst_5 [1] : vector<16x128xf32> to vector<16xf32>
    %10 = vector.shape_cast %9 : vector<16xf32> to vector<16x1xf32>
    %cst_6 = arith.constant 1.280000e+02 : f32
    %11 = vector.broadcast %cst_6 : f32 to vector<16x1xf32>
    %12 = arith.divf %10, %11 : vector<16x1xf32>
    %13 = arith.mulf %8, %8 : vector<16x128xf32>
    %cst_7 = arith.constant dense<0.000000e+00> : vector<16xf32>
    %14 = vector.multi_reduction <add>, %13, %cst_7 [1] : vector<16x128xf32> to vector<16xf32>
    %15 = vector.shape_cast %14 : vector<16xf32> to vector<16x1xf32>
    %cst_8 = arith.constant 1.280000e+02 : f32
    %16 = vector.broadcast %cst_8 : f32 to vector<16x1xf32>
    %17 = arith.divf %15, %16 : vector<16x1xf32>
    %18 = arith.mulf %12, %12 : vector<16x1xf32>
    %19 = arith.subf %17, %18 : vector<16x1xf32>
    %cst_9 = arith.constant 0.000000e+00 : f32
    %20 = vector.broadcast %cst_9 : f32 to vector<16x1xf32>
    %21 = arith.maximumf %19, %20 : vector<16x1xf32>
    %cst_10 = arith.constant 9.99999974E-6 : f32
    %22 = vector.broadcast %cst_10 : f32 to vector<16x1xf32>
    %23 = arith.addf %21, %22 : vector<16x1xf32>
    %24 = math.rsqrt %23 : vector<16x1xf32>
    %25 = vector.broadcast %12 : vector<16x1xf32> to vector<16x128xf32>
    %26 = arith.subf %8, %25 : vector<16x128xf32>
    %27 = vector.broadcast %24 : vector<16x1xf32> to vector<16x128xf32>
    %28 = arith.mulf %26, %27 : vector<16x128xf32>
    %29 = vector.broadcast %4 : vector<1x128xf32> to vector<16x128xf32>
    %30 = arith.mulf %28, %29 : vector<16x128xf32>
    %31 = vector.broadcast %5 : vector<1x128xf32> to vector<16x128xf32>
    %32 = arith.addf %30, %31 : vector<16x128xf32>
    %cst_11 = arith.constant 0.000000e+00 : f32
    %33 = vector.broadcast %cst_11 : f32 to vector<16x128xf32>
    %34 = arith.maximumf %32, %33 : vector<16x128xf32>
    %c0_12 = arith.constant 0 : index
    %c0_13 = arith.constant 0 : index
    %35 = vector.load %arg4[%c0_12, %c0_13] : memref<16x128xf32, #tpu.memory_space<vmem>>, vector<16x128xf32>
    tpu.vector_store %arg4[%c0_12, %c0_13], %34 {strides = array<i32>} : memref<16x128xf32, #tpu.memory_space<vmem>>, vector<16x128xf32>,
    return
  }
  func.func @transform_0(%arg0: i32) -> (i32, i32) {
    %c0_i32 = arith.constant 0 : i32
    %c0_i32_0 = arith.constant 0 : i32
    return %arg0, %c0_i32 : i32, i32
  }
  func.func @transform_1(%arg0: i32) -> (i32, i32) {
    %c0_i32 = arith.constant 0 : i32
    %c0_i32_0 = arith.constant 0 : i32
    %c0_i32_1 = arith.constant 0 : i32
    return %c0_i32, %c0_i32_0 : i32, i32
  }
  func.func @transform_2(%arg0: i32) -> (i32, i32) {
    %c0_i32 = arith.constant 0 : i32
    %c0_i32_0 = arith.constant 0 : i32
    %c0_i32_1 = arith.constant 0 : i32
    return %c0_i32, %c0_i32_0 : i32, i32
  }
  func.func @transform_3(%arg0: i32) -> (i32, i32) {
    %c0_i32 = arith.constant 0 : i32
    %c0_i32_0 = arith.constant 0 : i32
    return %arg0, %c0_i32 : i32, i32
  }
}

</mosaic_0001>

<bundles_post_ra>
// kernel: test_model_forward.1
= control target key start
LH: loop header
LB: loop body
LE: loop exit
PB: predicated region body
PF: predicated region fallthrough
CT: control target
= control target key end

     0   :  { %8 = vsyncpa [#allocation3], 0  ;;  %s374_s0 = inlined_call_operand.hbm [shape: f32[16,32], index: 0, kind: input, shape index: {}]   ;;  %s375_s1 = inlined_call_operand.hbm [shape: f32[32,128], index: 1, kind: input, shape index: {}]   ;;  %s376_s2 = inlined_call_operand.hbm [shape: f32[3,128], index: 2, kind: input, shape index: {}]   ;;  %s377_s3 = inlined_call_operand.hbm [shape: f32[16,128], index: 3, kind: output, shape index: {}]  }
   0x1   :  { %9 = vsyncpa [#allocation6], 0 }
   0x2   :  { %10 = vsyncpa [#allocation4], 0  ;;  %s325_s12 = smov [#allocation5]   ;;  %s326_s14 = smov [#allocation2]  }
   0x3   :  { %s28_s13 = sshll.u32 %s325_s12, 4  ;;  %s16_s15 = sshll.u32 %s326_s14, 4  ;;  %s29_s13 = int_to_ptr.vmem [resolvable:$true] %s28_s13  ;;  %s17_s15 = int_to_ptr.vmem [resolvable:$true] %s16_s15 }
   0x4   :  { %s247_s16 = scalar_lea.vmem %s29_s13, 512  ;;  %p252_p1 = scmp.lt.s32.totalorder %s29_s13, %s29_s13 }
   0x5   :  { %p248_p0 = scmp.ne.s32.totalorder %s29_s13, %s247_s16  ;;  %p253_p2 = scmp.lt.s32.totalorder %s247_s16, %s247_s16 }
   0x7   :  { %p254_p3 = por %p253_p2, %p252_p1 }
   0x9   :  { %p255_p4 = pnand %p254_p3, %p248_p0 }
   0xb   :  { %258 = shalt.err (!%p255_p4)
}
   0xc   :  { %s327_s17 = smov 128   ;;  %s328_s18 = smov 8  }
   0xd   :  { %34 = dma.hbm_to_vmem [thread:$0]  %s375_s1, 512, %s29_s13, [#allocation6], %s327_s17, %s327_s17, %s328_s18  }
   0xe   :  { %s267_s21 = scalar_lea.vmem %s17_s15, 256  ;;  %p272_p6 = scmp.lt.s32.totalorder %s17_s15, %s17_s15 }
   0xf   :  { %p268_p5 = scmp.ne.s32.totalorder %s17_s15, %s267_s21  ;;  %p273_p7 = scmp.lt.s32.totalorder %s267_s21, %s267_s21 }
  0x11   :  { %p274_p8 = por %p273_p7, %p272_p6 }
  0x13   :  { %p275_p9 = pnand %p274_p8, %p268_p5 }
  0x15   :  { %278 = shalt.err (!%p275_p9)
}
  0x16   :  { %22 = dma.hbm_to_vmem [thread:$0]  %s374_s0, 256, %s17_s15, [#allocation3], %s327_s17, %s327_s17, %s328_s18  }
  0x17   :  { %s329_s24 = smov [#allocation7]  }
  0x18   :  { %s41_s25 = sshll.u32 %s329_s24, 4  ;;  %s42_s25 = int_to_ptr.vmem [resolvable:$true] %s41_s25 }
  0x19   :  { %s287_s26 = scalar_lea.vmem %s42_s25, 64  ;;  %p292_p11 = scmp.lt.s32.totalorder %s42_s25, %s42_s25 }
  0x1a   :  { %p288_p10 = scmp.ne.s32.totalorder %s42_s25, %s287_s26  ;;  %p293_p12 = scmp.lt.s32.totalorder %s287_s26, %s287_s26 }
  0x1c   :  { %p294_p13 = por %p293_p12, %p292_p11 }
  0x1e   :  { %p295_p0 = pnand %p294_p13, %p288_p10 }
  0x20   :  { %298 = shalt.err (!%p295_p0)
}
  0x21   :  { %44 = dma.hbm_to_vmem [thread:$0]  %s376_s2, 64, %s42_s25, [#allocation6]  }
  0x22   :  { %319 = dma.done.wait [#allocation3], 256  }
  0x23   :  { %320 = vsyncadd [#allocation3], 4294967040 }
  0x24   :  { %321 = dma.done.wait [#allocation6], 576  }
  0x25   :  { %322 = vsyncadd [#allocation6], 4294966720  ;;  %vm65_vm0 = vcmask 261120   ;;  %v59_v0 = vld [vmem:[#allocation5 + $0x18] sm:$0xff]  ;;  %v58_v1 = vld [vmem:[#allocation5 + $0x10] sm:$0xff]  ;;  %v61_v6 = vlaneseq  ;;  %s330_s0 = smov [#allocation8]  }
  0x26   :  { %218 = vmatprep.subr.mxu0 %v59_v0  ;;  %v54_v2 = vld [vmem:[#allocation2] sm:$0xff]  ;;  %v57_v3 = vld [vmem:[#allocation5 + $0x8] sm:$0xff]  ;;  %v56_v4 = vld [vmem:[#allocation5] sm:$0xff]  ;;  %s197_s2 = sshll.u32 %s330_s0, 4  ;;  %s198_s2 = int_to_ptr.vmem [resolvable:$true] %s197_s2 }
  0x27   :  { %219 = vmatpush3.msra.mxu0 %v59_v0  ;;  %226 = vmatprep.mubr.msk.f32.mxu0 %vm65_vm0, %v54_v2  ;;  %v55_v5 = vld [vmem:[#allocation2 + $0x8] sm:$0xff]  ;;  %v62_v7 = vshrl.u32 %v61_v6, 7  ;;  %v60_v9 = vld [vmem:[#allocation7] sm:$0x7]  ;;  %s299_s28 = scalar_lea.vmem %s198_s2, 256  ;;  %p304_p2 = scmp.lt.s32.totalorder %s198_s2, %s198_s2 }
  0x28   :  { %220 = vmatprep.subr.mxu0 %v58_v1  ;;  %p300_p1 = scmp.ne.s32.totalorder %s198_s2, %s299_s28  ;;  %p305_p3 = scmp.lt.s32.totalorder %s299_s28, %s299_s28 }
  0x29   :  { %221 = vmatpush3.msra.mxu0 %v58_v1  ;;  %v63_v8 = vsub.s32 0, %v62_v7  ;;  %v178_v33 = vsub.s32 1, %v62_v7  ;;  %v184_v34 = vsub.s32 2, %v62_v7 }
  0x2a   :  { %222 = vmatprep.subr.mxu0 %v57_v3  ;;  %p306_p4 = por %p305_p3, %p304_p2 }
  0x2b   :  { %223 = vmatpush3.msra.mxu0 %v57_v3  ;;  %v64_v11 = vrot.slane %v60_v9, %v63_v8  ;;  %v179_v35 = vrot.slane %v60_v9, %v178_v33  ;;  %v185_v38 = vrot.slane %v60_v9, %v184_v34 }
  0x2c   :  { %224 = vmatprep.subr.mxu0 %v56_v4  ;;  %p307_p5 = pnand %p306_p4, %p300_p1 }
  0x2d   :  { %225 = vmatpush3.msra.mxu0 %v56_v4 }
  0x2e   :  { %227 = vmatmul.mubr.msk.f32.vlgmr.msra.gmra.mxu0 %vm65_vm0, %v55_v5 }
  0xee   :  { %v228_v10 = vpop.f32.mrf.mxu0 }
  0xef   :  { %v144_v14 = vadd.f32 %v228_v10, %v64_v11 }
  0xf0   :  { %v138_v12 = vpop.f32.mrf.mxu0 }
  0xf1   :  { %v139_v13 = vadd.f32 %v138_v12, %v64_v11  ;;  %v155_v16 = vmul.f32 %v144_v14, %v144_v14 }
  0xf3   :  { %147 = vadd.xlane.f32.xlu0 %v139_v13  ;;  %v154_v15 = vmul.f32 %v139_v13, %v139_v13 }
  0xf5   :  { %156 = vadd.xlane.f32.xlu1 %v154_v15 }
  0xf7   :  { %149 = vadd.xlane.f32.xlu0 %v144_v14 }
  0xf9   :  { %158 = vadd.xlane.f32.xlu1 %v155_v16 }
 0x17c   :  { %v148_v17 = vpop.xlane.xlu0 %147 }
 0x17d   :  { %v152_v18 = vmul.f32 0.0078125, %v148_v17 }
 0x17e   :  { %v157_v19 = vpop.xlane.xlu1 %156 }
 0x17f   :  { %v162_v20 = vmul.f32 %v152_v18, %v152_v18  ;;  %v160_v21 = vmul.f32 0.0078125, %v157_v19  ;;  %v172_v36 = vsub.f32 %v139_v13, %v152_v18 }
 0x180   :  { %v150_v22 = vpop.xlane.xlu0 %149 }
 0x181   :  { %v164_v23 = vsub.f32 %v160_v21, %v162_v20  ;;  %v153_v24 = vmul.f32 0.0078125, %v150_v22 }
 0x182   :  { %v159_v25 = vpop.xlane.xlu1 %158 }
 0x183   :  { %v166_v26 = vmax.f32 %v164_v23, 0.0  ;;  %v163_v27 = vmul.f32 %v153_v24, %v153_v24  ;;  %v161_v28 = vmul.f32 0.0078125, %v159_v25  ;;  %v173_v40 = vsub.f32 %v144_v14, %v153_v24 }
 0x185   :  { %v168_v29 = vadd.f32 1e-05, %v166_v26  ;;  %v165_v30 = vsub.f32 %v161_v28, %v163_v27 }
 0x187   :  { %235 = vrsqrt.f32 %v168_v29  ;;  %v167_v31 = vmax.f32 %v165_v30, 0.0 }
 0x189   :  { %v169_v32 = vadd.f32 1e-05, %v167_v31 }
 0x18b   :  { %237 = vrsqrt.f32 %v169_v32 }
 0x194   :  { %v236_v37 = vpop.eup %235 }
 0x195   :  { %v174_v39 = vmul.f32 %v236_v37, %v172_v36 }
 0x197   :  { %v180_v41 = vmul.f32 %v179_v35, %v174_v39 }
 0x198   :  { %v238_v42 = vpop.eup %237 }
 0x199   :  { %v175_v43 = vmul.f32 %v238_v42, %v173_v40  ;;  %v186_v44 = vadd.f32 %v185_v38, %v180_v41 }
 0x19b   :  { %v181_v45 = vmul.f32 %v179_v35, %v175_v43  ;;  %v188_v46 = vmax.f32 %v186_v44, 0.0 }
 0x19d   :  { %v187_v47 = vadd.f32 %v185_v38, %v181_v45  ;;  %190 = vst [vmem:[#allocation8] sm:$0xff] %v188_v46 }
 0x19f   :  { %v189_v48 = vmax.f32 %v187_v47, 0.0 }
 0x1a1   :  { %191 = vst [vmem:[#allocation8 + $0x8] sm:$0xff] %v189_v48 }
 0x1a2   :  { %310 = shalt.err (!%p307_p5)
}
 0x1a3   :  { %203 = dma.vmem_to_hbm [thread:$0]  %s198_s2, 256, %s377_s3, [#allocation4], %s327_s17, %s327_s17, %s328_s18  }
 0x1a4   :  { %323 = dma.done.wait [#allocation4], 256  }
 0x1a5   :  { %324 = vsyncadd [#allocation4], 4294967040 }
 0x1a6   :  { %207 = vsyncpa [#allocation3], 1 }
 0x1a7   :  { %208 = vsyncpa [#allocation6], 1 }
 0x1a8   :  { %209 = vsyncpa [#allocation4], 1 }

</bundles_post_ra>
